<compile_context>
chip_gen: v7x
topology: tpu7x:2x2x1
jax: 0.10.0
libtpu: 0.0.40
codegen_flags: <defaults>
</compile_context>

<pallas_src>
import functools

import jax
import jax.numpy as jnp
from jax.experimental import pallas as pl
from jax.experimental.pallas import tpu as pltpu

_LANE = 128
_STRIPE_ROWS = 256                      # 256x128 f32 stripe = 32 vregs live at once
_VMEM_BUDGET_BYTES = 20 * 1024 * 1024   # staged head copies per launch
_VMEM_LIMIT_BYTES = 32 * 1024 * 1024    # scoped VMEM limit (safe on v5e / v6e / v7x)


def _round_up(x, m):
    return ((x + m - 1) // m) * m


def _canonical_2d(x):
    """Free (bitcast) reshape of a score tensor to a 2-D view, lane-dense when the
    element count allows it.  No data movement for contiguous row-major arrays."""
    n = int(x.size)
    if n % _LANE == 0:
        return jnp.reshape(x, (n // _LANE, _LANE))
    if x.ndim >= 2 and x.shape[-1] > 0:
        return jnp.reshape(x, (n // x.shape[-1], x.shape[-1]))
    return jnp.reshape(x, (1, n))


def _vmem_footprint_bytes(shape, dtype):
    """Padded VMEM footprint of one staged head (sublane multiple depends on dtype)."""
    rows, cols = shape
    itemsize = jnp.dtype(dtype).itemsize
    sub = max(8, 32 // max(itemsize, 1))   # 8 for f32, 16 for bf16, 32 for 8-bit
    return _round_up(max(rows, 1), sub) * _round_up(max(cols, 1), _LANE) * itemsize


def _head_hinge_sum(buf_ref, is_fake):
    """sum(relu(1 + x)) (fake) or sum(relu(1 - x)) (real) over one staged head.
    Striped over sublane rows to bound vreg live ranges; one lane reduce per head."""
    rows, cols = buf_ref.shape
    col_acc = jnp.zeros((1, cols), jnp.float32)
    for r0 in range(0, rows, _STRIPE_ROWS):
        r1 = min(r0 + _STRIPE_ROWS, rows)
        x = buf_ref[r0:r1, :].astype(jnp.float32)
        h = jnp.maximum((1.0 + x) if is_fake else (1.0 - x), 0.0)
        col_acc = col_acc + jnp.sum(h, axis=0, keepdims=True)
    return jnp.sum(col_acc, axis=1, keepdims=True)          # (1, 1)


def _hinge_sum_kernel(*refs, num_heads, w_fake, w_real):
    """Single-step kernel: all heads, both branches.
    refs = [fake_0..fake_{H-1}, real_0..real_{H-1},        (raw HBM refs)
            out_fake, out_real,                             ((1,1) f32 VMEM outputs)
            buf_fake_0..buf_fake_{H-1}, buf_real_0.., sem]  (VMEM scratch + DMA sems)
    """
    in_refs = refs[: 2 * num_heads]
    out_fake_ref = refs[2 * num_heads]
    out_real_ref = refs[2 * num_heads + 1]
    buf_refs = refs[2 * num_heads + 2: 4 * num_heads + 2]
    sem = refs[4 * num_heads + 2]

    # Issue every HBM->VMEM copy up front so later transfers overlap the compute on
    # earlier heads (manual prefetch; no wrapper-side staging copies at all).
    copies = []
    for idx, (src, dst) in enumerate(zip(in_refs, buf_refs)):
        cp = pltpu.make_async_copy(src, dst, sem.at[idx])
        cp.start()
        copies.append(cp)

    acc_fake = jnp.zeros((1, 1), jnp.float32)
    acc_real = jnp.zeros((1, 1), jnp.float32)
    for i in range(num_heads):
        copies[i].wait()
        acc_fake = acc_fake + w_fake[i] * _head_hinge_sum(buf_refs[i], True)
    for i in range(num_heads):
        copies[num_heads + i].wait()
        acc_real = acc_real + w_real[i] * _head_hinge_sum(buf_refs[num_heads + i], False)

    out_fake_ref[...] = acc_fake
    out_real_ref[...] = acc_real


def _fused_hinge_group(fakes2d, reals2d):
    """One fused launch computing
       ( sum_h mean(relu(1 + fake_h)),  sum_h mean(relu(1 - real_h)) ).
    Heads stay in HBM at native dtype; the kernel DMAs them into per-head VMEM
    scratch and reduces them with static 1/n weights."""
    n = len(fakes2d)
    staged = list(fakes2d) + list(reals2d)
    w_fake = tuple(1.0 / float(x.size) for x in fakes2d)
    w_real = tuple(1.0 / float(x.size) for x in reals2d)

    total_elems = sum(int(x.size) for x in staged)
    total_bytes = sum(int(x.size) * jnp.dtype(x.dtype).itemsize for x in staged)
    cost = pl.CostEstimate(flops=3 * total_elems, transcendentals=0,
                           bytes_accessed=total_bytes + 8)

    kernel = functools.partial(_hinge_sum_kernel, num_heads=n,
                               w_fake=w_fake, w_real=w_real)
    out_fake, out_real = pl.pallas_call(
        kernel,
        out_shape=(jax.ShapeDtypeStruct((1, 1), jnp.float32),
                   jax.ShapeDtypeStruct((1, 1), jnp.float32)),
        in_specs=[pl.BlockSpec(memory_space=pl.ANY)] * (2 * n),
        out_specs=(pl.BlockSpec(memory_space=pltpu.MemorySpace.VMEM),
                   pl.BlockSpec(memory_space=pltpu.MemorySpace.VMEM)),
        scratch_shapes=[pltpu.VMEM(x.shape, x.dtype) for x in staged]
        + [pltpu.SemaphoreType.DMA((2 * n,))],
        compiler_params=pltpu.CompilerParams(vmem_limit_bytes=_VMEM_LIMIT_BYTES),
        cost_estimate=cost,
    )(*staged)
    return out_fake[0, 0], out_real[0, 0]


def _fused_hinge_d_sums(scores_fake, scores_real):
    """( sum_h mean(relu(1 + fake_h)), sum_h mean(relu(1 - real_h)) ) over zipped heads."""
    pairs = list(zip(scores_fake, scores_real))

    groups = []          # lists of (fake_2d, real_2d) per pallas launch
    jax_fallback = []    # pairs that cannot / should not be staged wholesale in VMEM
    cur, cur_bytes = [], 0
    for sf, sr in pairs:
        if int(sf.size) == 0 or int(sr.size) == 0:
            jax_fallback.append((sf, sr))   # matches torch: mean of empty -> nan
            continue
        f2 = _canonical_2d(sf)
        r2 = _canonical_2d(sr)
        b = (_vmem_footprint_bytes(f2.shape, f2.dtype)
             + _vmem_footprint_bytes(r2.shape, r2.dtype))
        if b > _VMEM_BUDGET_BYTES:
            # TODO(synk): add a chunked double-buffered DMA path for heads whose full
            # copy does not fit the VMEM budget; discriminator scores are tiny in practice.
            jax_fallback.append((sf, sr))
            continue
        if cur and cur_bytes + b > _VMEM_BUDGET_BYTES:
            groups.append(cur)
            cur, cur_bytes = [], 0
        cur.append((f2, r2))
        cur_bytes += b
    if cur:
        groups.append(cur)

    s_fake = jnp.zeros((), jnp.float32)
    s_real = jnp.zeros((), jnp.float32)
    for g in groups:
        gf, gr = _fused_hinge_group([p[0] for p in g], [p[1] for p in g])
        s_fake = s_fake + gf
        s_real = s_real + gr
    for sf, sr in jax_fallback:
        s_fake = s_fake + jnp.mean(jax.nn.relu(1.0 + sf.astype(jnp.float32)))
        s_real = s_real + jnp.mean(jax.nn.relu(1.0 - sr.astype(jnp.float32)))
    return s_fake, s_real


def hinge_d_loss(score_fake, score_real):
    """HingeDLoss.forward with reduction='mean': returns (loss_d, loss_fake, loss_real)."""
    s_fake, s_real = _fused_hinge_d_sums([score_fake], [score_real])
    return s_fake + s_real, s_fake, s_real


def d_loss(scores_fake, scores_real):
    """D_loss with reduction='mean' (the only reduction SEANetDiscriminatorLoss uses).
    Returns (total_loss, total_loss_real, total_loss_fake).  NOTE: the reference's
    non-list branch unpacks HingeDLoss's (loss, loss_fake, loss_real) into
    (total_loss, total_loss_real, total_loss_fake) — i.e. real/fake swap positions
    there; we reproduce that tuple ordering faithfully."""
    is_list = isinstance(scores_fake, (list, tuple))
    sf_list = list(scores_fake) if is_list else [scores_fake]
    sr_list = list(scores_real) if is_list else [scores_real]

    s_fake, s_real = _fused_hinge_d_sums(sf_list, sr_list)

    if is_list:
        total_loss = (s_fake + s_real) / len(sf_list)
        total_loss_fake = s_fake / len(sf_list)
        total_loss_real = s_real / len(sr_list)
    else:
        total_loss = s_fake + s_real
        total_loss_real = s_fake   # reference quirk in the non-list branch
        total_loss_fake = s_real
    return total_loss, total_loss_real, total_loss_fake


def seanet_discriminator_loss(scores_fake, scores_real):
    """SEANetDiscriminatorLoss.forward — no learned parameters."""
    hinge_loss, hinge_loss_real, hinge_loss_fake = d_loss(scores_fake, scores_real)
    return {
        "D_hinge_gan_loss": hinge_loss,
        "D_hinge_gan_loss_real": hinge_loss_real,
        "D_hinge_gan_loss_fake": hinge_loss_fake,
        "D_loss": hinge_loss,
    }


def _reference(scores_fake, scores_real):
    """Pure-JAX reference matching the PyTorch semantics (list inputs, reduction='mean')."""
    def one(sf, sr):
        lf = jnp.mean(jax.nn.relu(1.0 + sf.astype(jnp.float32)))
        lr = jnp.mean(jax.nn.relu(1.0 - sr.astype(jnp.float32)))
        return lf + lr, lf, lr

    totals = [one(sf, sr) for sf, sr in zip(scores_fake, scores_real)]
    n = len(scores_fake)
    loss = sum(t[0] for t in totals) / n
    loss_fake = sum(t[1] for t in totals) / n
    loss_real = sum(t[2] for t in totals) / n
    return loss, loss_real, loss_fake


if __name__ == "__main__":
    key = jax.random.PRNGKey(0)
    # Four SEANet-style discriminator heads: PyTorch (B, C, T) score maps with mixed
    # 128-aligned and non-aligned temporal resolutions.
    shapes = [(2, 1, 347), (2, 1, 173), (2, 1, 87), (2, 2, 1024)]
    keys = jax.random.split(key, 2 * len(shapes))
    scores_fake = [jax.random.normal(keys[2 * i], s, dtype=jnp.float32)
                   for i, s in enumerate(shapes)]
    scores_real = [jax.random.normal(keys[2 * i + 1], s, dtype=jnp.float32)
                   for i, s in enumerate(shapes)]

    out = seanet_discriminator_loss(scores_fake, scores_real)
    out = jax.block_until_ready(out)

    ref_loss, ref_real, ref_fake = _reference(scores_fake, scores_real)
    assert jnp.allclose(out["D_hinge_gan_loss"], ref_loss, atol=1e-5)
    assert jnp.allclose(out["D_hinge_gan_loss_real"], ref_real, atol=1e-5)
    assert jnp.allclose(out["D_hinge_gan_loss_fake"], ref_fake, atol=1e-5)
    assert jnp.allclose(out["D_loss"], ref_loss, atol=1e-5)

    # Non-list (single head) path — the reference swaps real/fake in this branch.
    out1 = seanet_discriminator_loss(scores_fake[0], scores_real[0])
    out1 = jax.block_until_ready(out1)
    lf1 = jnp.mean(jax.nn.relu(1.0 + scores_fake[0]))
    lr1 = jnp.mean(jax.nn.relu(1.0 - scores_real[0]))
    assert jnp.allclose(out1["D_loss"], lf1 + lr1, atol=1e-5)
    assert jnp.allclose(out1["D_hinge_gan_loss_real"], lf1, atol=1e-5)
    assert jnp.allclose(out1["D_hinge_gan_loss_fake"], lr1, atol=1e-5)

    print("KERNEL_OK")
</pallas_src>

<mosaic_0001>
module attributes {stable_mosaic.version = 11 : i64} {
  func.func @_hinge_sum_kernel(%arg0: memref<2x347xf32, #tpu.memory_space<any>>, %arg1: memref<2x173xf32, #tpu.memory_space<any>>, %arg2: memref<2x87xf32, #tpu.memory_space<any>>, %arg3: memref<32x128xf32, #tpu.memory_space<any>>, %arg4: memref<2x347xf32, #tpu.memory_space<any>>, %arg5: memref<2x173xf32, #tpu.memory_space<any>>, %arg6: memref<2x87xf32, #tpu.memory_space<any>>, %arg7: memref<32x128xf32, #tpu.memory_space<any>>, %arg8: memref<1x1xf32, #tpu.memory_space<vmem>>, %arg9: memref<1x1xf32, #tpu.memory_space<vmem>>, %arg10: memref<2x347xf32, #tpu.memory_space<vmem>>, %arg11: memref<2x173xf32, #tpu.memory_space<vmem>>, %arg12: memref<2x87xf32, #tpu.memory_space<vmem>>, %arg13: memref<32x128xf32, #tpu.memory_space<vmem>>, %arg14: memref<2x347xf32, #tpu.memory_space<vmem>>, %arg15: memref<2x173xf32, #tpu.memory_space<vmem>>, %arg16: memref<2x87xf32, #tpu.memory_space<vmem>>, %arg17: memref<32x128xf32, #tpu.memory_space<vmem>>, %arg18: memref<8x!tpu.dma_semaphore, #tpu.memory_space<semaphore_mem>>) attributes {dimension_semantics = [], scalar_prefetch = 0 : i64, scratch_operands = 9 : i64, tpu.core_type = #tpu.core_type<tc>} {
    %c0_i32 = arith.constant 0 : i32
    %0 = tpu.memref_slice %arg18[%c0_i32] : memref<8x!tpu.dma_semaphore, #tpu.memory_space<semaphore_mem>> -> memref<1x!tpu.dma_semaphore, #tpu.memory_space<semaphore_mem>>
    %1 = tpu.memref_squeeze %0 : memref<1x!tpu.dma_semaphore, #tpu.memory_space<semaphore_mem>> -> memref<!tpu.dma_semaphore, #tpu.memory_space<semaphore_mem>>
    tpu.enqueue_dma source(%arg0 : memref<2x347xf32, #tpu.memory_space<any>>) target(%arg10 : memref<2x347xf32, #tpu.memory_space<vmem>>) target_semaphore(%1 : memref<!tpu.dma_semaphore, #tpu.memory_space<semaphore_mem>>)
    %c1_i32 = arith.constant 1 : i32
    %2 = tpu.memref_slice %arg18[%c1_i32] : memref<8x!tpu.dma_semaphore, #tpu.memory_space<semaphore_mem>> -> memref<1x!tpu.dma_semaphore, #tpu.memory_space<semaphore_mem>>
    %3 = tpu.memref_squeeze %2 : memref<1x!tpu.dma_semaphore, #tpu.memory_space<semaphore_mem>> -> memref<!tpu.dma_semaphore, #tpu.memory_space<semaphore_mem>>
    tpu.enqueue_dma source(%arg1 : memref<2x173xf32, #tpu.memory_space<any>>) target(%arg11 : memref<2x173xf32, #tpu.memory_space<vmem>>) target_semaphore(%3 : memref<!tpu.dma_semaphore, #tpu.memory_space<semaphore_mem>>)
    %c2_i32 = arith.constant 2 : i32
    %4 = tpu.memref_slice %arg18[%c2_i32] : memref<8x!tpu.dma_semaphore, #tpu.memory_space<semaphore_mem>> -> memref<1x!tpu.dma_semaphore, #tpu.memory_space<semaphore_mem>>
    %5 = tpu.memref_squeeze %4 : memref<1x!tpu.dma_semaphore, #tpu.memory_space<semaphore_mem>> -> memref<!tpu.dma_semaphore, #tpu.memory_space<semaphore_mem>>
    tpu.enqueue_dma source(%arg2 : memref<2x87xf32, #tpu.memory_space<any>>) target(%arg12 : memref<2x87xf32, #tpu.memory_space<vmem>>) target_semaphore(%5 : memref<!tpu.dma_semaphore, #tpu.memory_space<semaphore_mem>>)
    %c3_i32 = arith.constant 3 : i32
    %6 = tpu.memref_slice %arg18[%c3_i32] : memref<8x!tpu.dma_semaphore, #tpu.memory_space<semaphore_mem>> -> memref<1x!tpu.dma_semaphore, #tpu.memory_space<semaphore_mem>>
    %7 = tpu.memref_squeeze %6 : memref<1x!tpu.dma_semaphore, #tpu.memory_space<semaphore_mem>> -> memref<!tpu.dma_semaphore, #tpu.memory_space<semaphore_mem>>
    tpu.enqueue_dma source(%arg3 : memref<32x128xf32, #tpu.memory_space<any>>) target(%arg13 : memref<32x128xf32, #tpu.memory_space<vmem>>) target_semaphore(%7 : memref<!tpu.dma_semaphore, #tpu.memory_space<semaphore_mem>>)
    %c4_i32 = arith.constant 4 : i32
    %8 = tpu.memref_slice %arg18[%c4_i32] : memref<8x!tpu.dma_semaphore, #tpu.memory_space<semaphore_mem>> -> memref<1x!tpu.dma_semaphore, #tpu.memory_space<semaphore_mem>>
    %9 = tpu.memref_squeeze %8 : memref<1x!tpu.dma_semaphore, #tpu.memory_space<semaphore_mem>> -> memref<!tpu.dma_semaphore, #tpu.memory_space<semaphore_mem>>
    tpu.enqueue_dma source(%arg4 : memref<2x347xf32, #tpu.memory_space<any>>) target(%arg14 : memref<2x347xf32, #tpu.memory_space<vmem>>) target_semaphore(%9 : memref<!tpu.dma_semaphore, #tpu.memory_space<semaphore_mem>>)
    %c5_i32 = arith.constant 5 : i32
    %10 = tpu.memref_slice %arg18[%c5_i32] : memref<8x!tpu.dma_semaphore, #tpu.memory_space<semaphore_mem>> -> memref<1x!tpu.dma_semaphore, #tpu.memory_space<semaphore_mem>>
    %11 = tpu.memref_squeeze %10 : memref<1x!tpu.dma_semaphore, #tpu.memory_space<semaphore_mem>> -> memref<!tpu.dma_semaphore, #tpu.memory_space<semaphore_mem>>
    tpu.enqueue_dma source(%arg5 : memref<2x173xf32, #tpu.memory_space<any>>) target(%arg15 : memref<2x173xf32, #tpu.memory_space<vmem>>) target_semaphore(%11 : memref<!tpu.dma_semaphore, #tpu.memory_space<semaphore_mem>>)
    %c6_i32 = arith.constant 6 : i32
    %12 = tpu.memref_slice %arg18[%c6_i32] : memref<8x!tpu.dma_semaphore, #tpu.memory_space<semaphore_mem>> -> memref<1x!tpu.dma_semaphore, #tpu.memory_space<semaphore_mem>>
    %13 = tpu.memref_squeeze %12 : memref<1x!tpu.dma_semaphore, #tpu.memory_space<semaphore_mem>> -> memref<!tpu.dma_semaphore, #tpu.memory_space<semaphore_mem>>
    tpu.enqueue_dma source(%arg6 : memref<2x87xf32, #tpu.memory_space<any>>) target(%arg16 : memref<2x87xf32, #tpu.memory_space<vmem>>) target_semaphore(%13 : memref<!tpu.dma_semaphore, #tpu.memory_space<semaphore_mem>>)
    %c7_i32 = arith.constant 7 : i32
    %14 = tpu.memref_slice %arg18[%c7_i32] : memref<8x!tpu.dma_semaphore, #tpu.memory_space<semaphore_mem>> -> memref<1x!tpu.dma_semaphore, #tpu.memory_space<semaphore_mem>>
    %15 = tpu.memref_squeeze %14 : memref<1x!tpu.dma_semaphore, #tpu.memory_space<semaphore_mem>> -> memref<!tpu.dma_semaphore, #tpu.memory_space<semaphore_mem>>
    tpu.enqueue_dma source(%arg7 : memref<32x128xf32, #tpu.memory_space<any>>) target(%arg17 : memref<32x128xf32, #tpu.memory_space<vmem>>) target_semaphore(%15 : memref<!tpu.dma_semaphore, #tpu.memory_space<semaphore_mem>>)
    %cst = arith.constant 0.000000e+00 : f32
    %16 = vector.broadcast %cst : f32 to vector<1x1xf32>
    %cst_0 = arith.constant 0.000000e+00 : f32
    %17 = vector.broadcast %cst_0 : f32 to vector<1x1xf32>
    %c0_i32_1 = arith.constant 0 : i32
    %18 = tpu.memref_slice %arg18[%c0_i32_1] : memref<8x!tpu.dma_semaphore, #tpu.memory_space<semaphore_mem>> -> memref<1x!tpu.dma_semaphore, #tpu.memory_space<semaphore_mem>>
    %19 = tpu.memref_squeeze %18 : memref<1x!tpu.dma_semaphore, #tpu.memory_space<semaphore_mem>> -> memref<!tpu.dma_semaphore, #tpu.memory_space<semaphore_mem>>
    tpu.wait_dma2 semaphore(%19 : memref<!tpu.dma_semaphore, #tpu.memory_space<semaphore_mem>>) src(%arg0 : memref<2x347xf32, #tpu.memory_space<any>>) dst(%arg10 : memref<2x347xf32, #tpu.memory_space<vmem>>)
    %cst_2 = arith.constant 0.000000e+00 : f32
    %20 = vector.broadcast %cst_2 : f32 to vector<1x347xf32>
    %c0 = arith.constant 0 : index
    %c0_3 = arith.constant 0 : index
    %21 = vector.load %arg10[%c0, %c0_3] : memref<2x347xf32, #tpu.memory_space<vmem>>, vector<2x347xf32>
    %cst_4 = arith.constant 1.000000e+00 : f32
    %22 = vector.broadcast %cst_4 : f32 to vector<2x347xf32>
    %23 = arith.addf %22, %21 : vector<2x347xf32>
    %cst_5 = arith.constant 0.000000e+00 : f32
    %24 = vector.broadcast %cst_5 : f32 to vector<2x347xf32>
    %25 = arith.maximumf %23, %24 : vector<2x347xf32>
    %cst_6 = arith.constant dense<0.000000e+00> : vector<347xf32>
    %26 = vector.multi_reduction <add>, %25, %cst_6 [0] : vector<2x347xf32> to vector<347xf32>
    %27 = vector.shape_cast %26 : vector<347xf32> to vector<1x347xf32>
    %28 = arith.addf %20, %27 : vector<1x347xf32>
    %cst_7 = arith.constant dense<0.000000e+00> : vector<1xf32>
    %29 = vector.multi_reduction <add>, %28, %cst_7 [1] : vector<1x347xf32> to vector<1xf32>
    %30 = vector.shape_cast %29 : vector<1xf32> to vector<1x1xf32>
    %cst_8 = arith.constant 0.00144092215 : f32
    %31 = vector.broadcast %cst_8 : f32 to vector<1x1xf32>
    %32 = arith.mulf %31, %30 : vector<1x1xf32>
    %33 = arith.addf %16, %32 : vector<1x1xf32>
    %c1_i32_9 = arith.constant 1 : i32
    %34 = tpu.memref_slice %arg18[%c1_i32_9] : memref<8x!tpu.dma_semaphore, #tpu.memory_space<semaphore_mem>> -> memref<1x!tpu.dma_semaphore, #tpu.memory_space<semaphore_mem>>
    %35 = tpu.memref_squeeze %34 : memref<1x!tpu.dma_semaphore, #tpu.memory_space<semaphore_mem>> -> memref<!tpu.dma_semaphore, #tpu.memory_space<semaphore_mem>>
    tpu.wait_dma2 semaphore(%35 : memref<!tpu.dma_semaphore, #tpu.memory_space<semaphore_mem>>) src(%arg1 : memref<2x173xf32, #tpu.memory_space<any>>) dst(%arg11 : memref<2x173xf32, #tpu.memory_space<vmem>>)
    %cst_10 = arith.constant 0.000000e+00 : f32
    %36 = vector.broadcast %cst_10 : f32 to vector<1x173xf32>
    %c0_11 = arith.constant 0 : index
    %c0_12 = arith.constant 0 : index
    %37 = vector.load %arg11[%c0_11, %c0_12] : memref<2x173xf32, #tpu.memory_space<vmem>>, vector<2x173xf32>
    %cst_13 = arith.constant 1.000000e+00 : f32
    %38 = vector.broadcast %cst_13 : f32 to vector<2x173xf32>
    %39 = arith.addf %38, %37 : vector<2x173xf32>
    %cst_14 = arith.constant 0.000000e+00 : f32
    %40 = vector.broadcast %cst_14 : f32 to vector<2x173xf32>
    %41 = arith.maximumf %39, %40 : vector<2x173xf32>
    %cst_15 = arith.constant dense<0.000000e+00> : vector<173xf32>
    %42 = vector.multi_reduction <add>, %41, %cst_15 [0] : vector<2x173xf32> to vector<173xf32>
    %43 = vector.shape_cast %42 : vector<173xf32> to vector<1x173xf32>
    %44 = arith.addf %36, %43 : vector<1x173xf32>
    %cst_16 = arith.constant dense<0.000000e+00> : vector<1xf32>
    %45 = vector.multi_reduction <add>, %44, %cst_16 [1] : vector<1x173xf32> to vector<1xf32>
    %46 = vector.shape_cast %45 : vector<1xf32> to vector<1x1xf32>
    %cst_17 = arith.constant 0.00289017335 : f32
    %47 = vector.broadcast %cst_17 : f32 to vector<1x1xf32>
    %48 = arith.mulf %47, %46 : vector<1x1xf32>
    %49 = arith.addf %33, %48 : vector<1x1xf32>
    %c2_i32_18 = arith.constant 2 : i32
    %50 = tpu.memref_slice %arg18[%c2_i32_18] : memref<8x!tpu.dma_semaphore, #tpu.memory_space<semaphore_mem>> -> memref<1x!tpu.dma_semaphore, #tpu.memory_space<semaphore_mem>>
    %51 = tpu.memref_squeeze %50 : memref<1x!tpu.dma_semaphore, #tpu.memory_space<semaphore_mem>> -> memref<!tpu.dma_semaphore, #tpu.memory_space<semaphore_mem>>
    tpu.wait_dma2 semaphore(%51 : memref<!tpu.dma_semaphore, #tpu.memory_space<semaphore_mem>>) src(%arg2 : memref<2x87xf32, #tpu.memory_space<any>>) dst(%arg12 : memref<2x87xf32, #tpu.memory_space<vmem>>)
    %cst_19 = arith.constant 0.000000e+00 : f32
    %52 = vector.broadcast %cst_19 : f32 to vector<1x87xf32>
    %c0_20 = arith.constant 0 : index
    %c0_21 = arith.constant 0 : index
    %53 = vector.load %arg12[%c0_20, %c0_21] : memref<2x87xf32, #tpu.memory_space<vmem>>, vector<2x87xf32>
    %cst_22 = arith.constant 1.000000e+00 : f32
    %54 = vector.broadcast %cst_22 : f32 to vector<2x87xf32>
    %55 = arith.addf %54, %53 : vector<2x87xf32>
    %cst_23 = arith.constant 0.000000e+00 : f32
    %56 = vector.broadcast %cst_23 : f32 to vector<2x87xf32>
    %57 = arith.maximumf %55, %56 : vector<2x87xf32>
    %cst_24 = arith.constant dense<0.000000e+00> : vector<87xf32>
    %58 = vector.multi_reduction <add>, %57, %cst_24 [0] : vector<2x87xf32> to vector<87xf32>
    %59 = vector.shape_cast %58 : vector<87xf32> to vector<1x87xf32>
    %60 = arith.addf %52, %59 : vector<1x87xf32>
    %cst_25 = arith.constant dense<0.000000e+00> : vector<1xf32>
    %61 = vector.multi_reduction <add>, %60, %cst_25 [1] : vector<1x87xf32> to vector<1xf32>
    %62 = vector.shape_cast %61 : vector<1xf32> to vector<1x1xf32>
    %cst_26 = arith.constant 0.00574712642 : f32
    %63 = vector.broadcast %cst_26 : f32 to vector<1x1xf32>
    %64 = arith.mulf %63, %62 : vector<1x1xf32>
    %65 = arith.addf %49, %64 : vector<1x1xf32>
    %c3_i32_27 = arith.constant 3 : i32
    %66 = tpu.memref_slice %arg18[%c3_i32_27] : memref<8x!tpu.dma_semaphore, #tpu.memory_space<semaphore_mem>> -> memref<1x!tpu.dma_semaphore, #tpu.memory_space<semaphore_mem>>
    %67 = tpu.memref_squeeze %66 : memref<1x!tpu.dma_semaphore, #tpu.memory_space<semaphore_mem>> -> memref<!tpu.dma_semaphore, #tpu.memory_space<semaphore_mem>>
    tpu.wait_dma2 semaphore(%67 : memref<!tpu.dma_semaphore, #tpu.memory_space<semaphore_mem>>) src(%arg3 : memref<32x128xf32, #tpu.memory_space<any>>) dst(%arg13 : memref<32x128xf32, #tpu.memory_space<vmem>>)
    %cst_28 = arith.constant 0.000000e+00 : f32
    %68 = vector.broadcast %cst_28 : f32 to vector<1x128xf32>
    %c0_29 = arith.constant 0 : index
    %c0_30 = arith.constant 0 : index
    %69 = vector.load %arg13[%c0_29, %c0_30] : memref<32x128xf32, #tpu.memory_space<vmem>>, vector<32x128xf32>
    %cst_31 = arith.constant 1.000000e+00 : f32
    %70 = vector.broadcast %cst_31 : f32 to vector<32x128xf32>
    %71 = arith.addf %70, %69 : vector<32x128xf32>
    %cst_32 = arith.constant 0.000000e+00 : f32
    %72 = vector.broadcast %cst_32 : f32 to vector<32x128xf32>
    %73 = arith.maximumf %71, %72 : vector<32x128xf32>
    %cst_33 = arith.constant dense<0.000000e+00> : vector<128xf32>
    %74 = vector.multi_reduction <add>, %73, %cst_33 [0] : vector<32x128xf32> to vector<128xf32>
    %75 = vector.shape_cast %74 : vector<128xf32> to vector<1x128xf32>
    %76 = arith.addf %68, %75 : vector<1x128xf32>
    %cst_34 = arith.constant dense<0.000000e+00> : vector<1xf32>
    %77 = vector.multi_reduction <add>, %76, %cst_34 [1] : vector<1x128xf32> to vector<1xf32>
    %78 = vector.shape_cast %77 : vector<1xf32> to vector<1x1xf32>
    %cst_35 = arith.constant 2.44140625E-4 : f32
    %79 = vector.broadcast %cst_35 : f32 to vector<1x1xf32>
    %80 = arith.mulf %79, %78 : vector<1x1xf32>
    %81 = arith.addf %65, %80 : vector<1x1xf32>
    %c4_i32_36 = arith.constant 4 : i32
    %82 = tpu.memref_slice %arg18[%c4_i32_36] : memref<8x!tpu.dma_semaphore, #tpu.memory_space<semaphore_mem>> -> memref<1x!tpu.dma_semaphore, #tpu.memory_space<semaphore_mem>>
    %83 = tpu.memref_squeeze %82 : memref<1x!tpu.dma_semaphore, #tpu.memory_space<semaphore_mem>> -> memref<!tpu.dma_semaphore, #tpu.memory_space<semaphore_mem>>
    tpu.wait_dma2 semaphore(%83 : memref<!tpu.dma_semaphore, #tpu.memory_space<semaphore_mem>>) src(%arg4 : memref<2x347xf32, #tpu.memory_space<any>>) dst(%arg14 : memref<2x347xf32, #tpu.memory_space<vmem>>)
    %cst_37 = arith.constant 0.000000e+00 : f32
    %84 = vector.broadcast %cst_37 : f32 to vector<1x347xf32>
    %c0_38 = arith.constant 0 : index
    %c0_39 = arith.constant 0 : index
    %85 = vector.load %arg14[%c0_38, %c0_39] : memref<2x347xf32, #tpu.memory_space<vmem>>, vector<2x347xf32>
    %cst_40 = arith.constant 1.000000e+00 : f32
    %86 = vector.broadcast %cst_40 : f32 to vector<2x347xf32>
    %87 = arith.subf %86, %85 : vector<2x347xf32>
    %cst_41 = arith.constant 0.000000e+00 : f32
    %88 = vector.broadcast %cst_41 : f32 to vector<2x347xf32>
    %89 = arith.maximumf %87, %88 : vector<2x347xf32>
    %cst_42 = arith.constant dense<0.000000e+00> : vector<347xf32>
    %90 = vector.multi_reduction <add>, %89, %cst_42 [0] : vector<2x347xf32> to vector<347xf32>
    %91 = vector.shape_cast %90 : vector<347xf32> to vector<1x347xf32>
    %92 = arith.addf %84, %91 : vector<1x347xf32>
    %cst_43 = arith.constant dense<0.000000e+00> : vector<1xf32>
    %93 = vector.multi_reduction <add>, %92, %cst_43 [1] : vector<1x347xf32> to vector<1xf32>
    %94 = vector.shape_cast %93 : vector<1xf32> to vector<1x1xf32>
    %cst_44 = arith.constant 0.00144092215 : f32
    %95 = vector.broadcast %cst_44 : f32 to vector<1x1xf32>
    %96 = arith.mulf %95, %94 : vector<1x1xf32>
    %97 = arith.addf %17, %96 : vector<1x1xf32>
    %c5_i32_45 = arith.constant 5 : i32
    %98 = tpu.memref_slice %arg18[%c5_i32_45] : memref<8x!tpu.dma_semaphore, #tpu.memory_space<semaphore_mem>> -> memref<1x!tpu.dma_semaphore, #tpu.memory_space<semaphore_mem>>
    %99 = tpu.memref_squeeze %98 : memref<1x!tpu.dma_semaphore, #tpu.memory_space<semaphore_mem>> -> memref<!tpu.dma_semaphore, #tpu.memory_space<semaphore_mem>>
    tpu.wait_dma2 semaphore(%99 : memref<!tpu.dma_semaphore, #tpu.memory_space<semaphore_mem>>) src(%arg5 : memref<2x173xf32, #tpu.memory_space<any>>) dst(%arg15 : memref<2x173xf32, #tpu.memory_space<vmem>>)
    %cst_46 = arith.constant 0.000000e+00 : f32
    %100 = vector.broadcast %cst_46 : f32 to vector<1x173xf32>
    %c0_47 = arith.constant 0 : index
    %c0_48 = arith.constant 0 : index
    %101 = vector.load %arg15[%c0_47, %c0_48] : memref<2x173xf32, #tpu.memory_space<vmem>>, vector<2x173xf32>
    %cst_49 = arith.constant 1.000000e+00 : f32
    %102 = vector.broadcast %cst_49 : f32 to vector<2x173xf32>
    %103 = arith.subf %102, %101 : vector<2x173xf32>
    %cst_50 = arith.constant 0.000000e+00 : f32
    %104 = vector.broadcast %cst_50 : f32 to vector<2x173xf32>
    %105 = arith.maximumf %103, %104 : vector<2x173xf32>
    %cst_51 = arith.constant dense<0.000000e+00> : vector<173xf32>
    %106 = vector.multi_reduction <add>, %105, %cst_51 [0] : vector<2x173xf32> to vector<173xf32>
    %107 = vector.shape_cast %106 : vector<173xf32> to vector<1x173xf32>
    %108 = arith.addf %100, %107 : vector<1x173xf32>
    %cst_52 = arith.constant dense<0.000000e+00> : vector<1xf32>
    %109 = vector.multi_reduction <add>, %108, %cst_52 [1] : vector<1x173xf32> to vector<1xf32>
    %110 = vector.shape_cast %109 : vector<1xf32> to vector<1x1xf32>
    %cst_53 = arith.constant 0.00289017335 : f32
    %111 = vector.broadcast %cst_53 : f32 to vector<1x1xf32>
    %112 = arith.mulf %111, %110 : vector<1x1xf32>
    %113 = arith.addf %97, %112 : vector<1x1xf32>
    %c6_i32_54 = arith.constant 6 : i32
    %114 = tpu.memref_slice %arg18[%c6_i32_54] : memref<8x!tpu.dma_semaphore, #tpu.memory_space<semaphore_mem>> -> memref<1x!tpu.dma_semaphore, #tpu.memory_space<semaphore_mem>>
    %115 = tpu.memref_squeeze %114 : memref<1x!tpu.dma_semaphore, #tpu.memory_space<semaphore_mem>> -> memref<!tpu.dma_semaphore, #tpu.memory_space<semaphore_mem>>
    tpu.wait_dma2 semaphore(%115 : memref<!tpu.dma_semaphore, #tpu.memory_space<semaphore_mem>>) src(%arg6 : memref<2x87xf32, #tpu.memory_space<any>>) dst(%arg16 : memref<2x87xf32, #tpu.memory_space<vmem>>)
    %cst_55 = arith.constant 0.000000e+00 : f32
    %116 = vector.broadcast %cst_55 : f32 to vector<1x87xf32>
    %c0_56 = arith.constant 0 : index
    %c0_57 = arith.constant 0 : index
    %117 = vector.load %arg16[%c0_56, %c0_57] : memref<2x87xf32, #tpu.memory_space<vmem>>, vector<2x87xf32>
    %cst_58 = arith.constant 1.000000e+00 : f32
    %118 = vector.broadcast %cst_58 : f32 to vector<2x87xf32>
    %119 = arith.subf %118, %117 : vector<2x87xf32>
    %cst_59 = arith.constant 0.000000e+00 : f32
    %120 = vector.broadcast %cst_59 : f32 to vector<2x87xf32>
    %121 = arith.maximumf %119, %120 : vector<2x87xf32>
    %cst_60 = arith.constant dense<0.000000e+00> : vector<87xf32>
    %122 = vector.multi_reduction <add>, %121, %cst_60 [0] : vector<2x87xf32> to vector<87xf32>
    %123 = vector.shape_cast %122 : vector<87xf32> to vector<1x87xf32>
    %124 = arith.addf %116, %123 : vector<1x87xf32>
    %cst_61 = arith.constant dense<0.000000e+00> : vector<1xf32>
    %125 = vector.multi_reduction <add>, %124, %cst_61 [1] : vector<1x87xf32> to vector<1xf32>
    %126 = vector.shape_cast %125 : vector<1xf32> to vector<1x1xf32>
    %cst_62 = arith.constant 0.00574712642 : f32
    %127 = vector.broadcast %cst_62 : f32 to vector<1x1xf32>
    %128 = arith.mulf %127, %126 : vector<1x1xf32>
    %129 = arith.addf %113, %128 : vector<1x1xf32>
    %c7_i32_63 = arith.constant 7 : i32
    %130 = tpu.memref_slice %arg18[%c7_i32_63] : memref<8x!tpu.dma_semaphore, #tpu.memory_space<semaphore_mem>> -> memref<1x!tpu.dma_semaphore, #tpu.memory_space<semaphore_mem>>
    %131 = tpu.memref_squeeze %130 : memref<1x!tpu.dma_semaphore, #tpu.memory_space<semaphore_mem>> -> memref<!tpu.dma_semaphore, #tpu.memory_space<semaphore_mem>>
    tpu.wait_dma2 semaphore(%131 : memref<!tpu.dma_semaphore, #tpu.memory_space<semaphore_mem>>) src(%arg7 : memref<32x128xf32, #tpu.memory_space<any>>) dst(%arg17 : memref<32x128xf32, #tpu.memory_space<vmem>>)
    %cst_64 = arith.constant 0.000000e+00 : f32
    %132 = vector.broadcast %cst_64 : f32 to vector<1x128xf32>
    %c0_65 = arith.constant 0 : index
    %c0_66 = arith.constant 0 : index
    %133 = vector.load %arg17[%c0_65, %c0_66] : memref<32x128xf32, #tpu.memory_space<vmem>>, vector<32x128xf32>
    %cst_67 = arith.constant 1.000000e+00 : f32
    %134 = vector.broadcast %cst_67 : f32 to vector<32x128xf32>
    %135 = arith.subf %134, %133 : vector<32x128xf32>
    %cst_68 = arith.constant 0.000000e+00 : f32
    %136 = vector.broadcast %cst_68 : f32 to vector<32x128xf32>
    %137 = arith.maximumf %135, %136 : vector<32x128xf32>
    %cst_69 = arith.constant dense<0.000000e+00> : vector<128xf32>
    %138 = vector.multi_reduction <add>, %137, %cst_69 [0] : vector<32x128xf32> to vector<128xf32>
    %139 = vector.shape_cast %138 : vector<128xf32> to vector<1x128xf32>
    %140 = arith.addf %132, %139 : vector<1x128xf32>
    %cst_70 = arith.constant dense<0.000000e+00> : vector<1xf32>
    %141 = vector.multi_reduction <add>, %140, %cst_70 [1] : vector<1x128xf32> to vector<1xf32>
    %142 = vector.shape_cast %141 : vector<1xf32> to vector<1x1xf32>
    %cst_71 = arith.constant 2.44140625E-4 : f32
    %143 = vector.broadcast %cst_71 : f32 to vector<1x1xf32>
    %144 = arith.mulf %143, %142 : vector<1x1xf32>
    %145 = arith.addf %129, %144 : vector<1x1xf32>
    %c0_72 = arith.constant 0 : index
    %c0_73 = arith.constant 0 : index
    %146 = vector.load %arg8[%c0_72, %c0_73] : memref<1x1xf32, #tpu.memory_space<vmem>>, vector<1x1xf32>
    tpu.vector_store %arg8[%c0_72, %c0_73], %81 {strides = array<i32>} : memref<1x1xf32, #tpu.memory_space<vmem>>, vector<1x1xf32>,
    %c0_74 = arith.constant 0 : index
    %c0_75 = arith.constant 0 : index
    %147 = vector.load %arg9[%c0_74, %c0_75] : memref<1x1xf32, #tpu.memory_space<vmem>>, vector<1x1xf32>
    tpu.vector_store %arg9[%c0_74, %c0_75], %145 {strides = array<i32>} : memref<1x1xf32, #tpu.memory_space<vmem>>, vector<1x1xf32>,
    return
  }
}

</mosaic_0001>

<bundles_post_ra>
// kernel: tpu_custom_call.1
= control target key start
LH: loop header
LB: loop body
LE: loop exit
PB: predicated region body
PF: predicated region fallthrough
CT: control target
= control target key end

     0   :  { %15 = vsyncpa [#allocation12], 0  ;;  %s990_s0 = inlined_call_operand.hbm [shape: f32[2,347], index: 0, kind: input, shape index: {}]   ;;  %s991_s1 = inlined_call_operand.hbm [shape: f32[2,173], index: 1, kind: input, shape index: {}]   ;;  %s992_s2 = inlined_call_operand.hbm [shape: f32[2,87], index: 2, kind: input, shape index: {}]   ;;  %s993_s3 = inlined_call_operand.hbm [shape: f32[32,128], index: 3, kind: input, shape index: {}]   ;;  %s994_s4 = inlined_call_operand.vmem [shape: f32[2,347], index: 4, kind: input, shape index: {}]   ;;  %s995_s5 = inlined_call_operand.vmem [shape: f32[2,173], index: 5, kind: input, shape index: {}]   ;;  %s996_s6 = inlined_call_operand.vmem [shape: f32[2,87], index: 6, kind: input, shape index: {}]   ;;  %s997_s7 = inlined_call_operand.hbm [shape: f32[32,128], index: 7, kind: input, shape index: {}]   ;;  %s998_s8 = inlined_call_operand.hbm [shape: f32[1,1], index: 8, kind: output, shape index: {0}]   ;;  %s999_s9 = inlined_call_operand.hbm [shape: f32[1,1], index: 9, kind: output, shape index: {1}]  }
   0x1   :  { %16 = vsyncpa [#allocation14], 0  ;;  %v82_v0 = vld [vmem:[%s994_s4] sm:$0x3f]  ;;  %s808_s11 = smov [#allocation2]   ;;  %s809_s13 = smov [#allocation3]  }
   0x2   :  { %s24_s12 = sshll.u32 %s808_s11, 4  ;;  %s36_s14 = sshll.u32 %s809_s13, 4  ;;  %83 = vst [vmem:[#allocation6] sm:$0x3f] %v82_v0  ;;  %s25_s12 = int_to_ptr.vmem [resolvable:$true] %s24_s12  ;;  %s37_s14 = int_to_ptr.vmem [resolvable:$true] %s36_s14 }
   0x3   :  { %s634_s17 = scalar_lea.hbm %s990_s0, 96 }
   0x4   :  { %p635_p0 = scmp.ne.s32.totalorder %s990_s0, %s634_s17  ;;  %p638_p1 = scmp.lt.u32.totalorder %s634_s17, %s990_s0 }
   0x6   :  { %p640_p2 = pnand %p638_p1, %p635_p0 }
   0x8   :  { %643 = shalt.err (!%p640_p2)  }
   0x9   :  { %s644_s4 = scalar_lea.vmem %s25_s12, 96  ;;  %p649_p4 = scmp.lt.s32.totalorder %s25_s12, %s25_s12 }
   0xa   :  { %p645_p3 = scmp.ne.s32.totalorder %s25_s12, %s644_s4  ;;  %p650_p5 = scmp.lt.s32.totalorder %s644_s4, %s644_s4 }
   0xc   :  { %p651_p6 = por %p650_p5, %p649_p4 }
   0xe   :  { %p652_p7 = pnand %p651_p6, %p645_p3 }
  0x10   :  { %655 = shalt.err (!%p652_p7)  }
  0x11   :  { %27 = dma.hbm_to_vmem [thread:$0]  %s990_s0, 96, %s25_s12, [#allocation10] }
  0x12   :  { %s656_s26 = scalar_lea.hbm %s991_s1, 64 }
  0x13   :  { %p657_p8 = scmp.ne.s32.totalorder %s991_s1, %s656_s26  ;;  %p660_p9 = scmp.lt.u32.totalorder %s656_s26, %s991_s1 }
  0x15   :  { %p662_p10 = pnand %p660_p9, %p657_p8 }
  0x17   :  { %665 = shalt.err (!%p662_p10)  }
  0x18   :  { %s666_s10 = scalar_lea.vmem %s37_s14, 64  ;;  %p671_p12 = scmp.lt.s32.totalorder %s37_s14, %s37_s14 }
  0x19   :  { %p667_p11 = scmp.ne.s32.totalorder %s37_s14, %s666_s10  ;;  %p672_p13 = scmp.lt.s32.totalorder %s666_s10, %s666_s10 }
  0x1b   :  { %p673_p0 = por %p672_p13, %p671_p12 }
  0x1d   :  { %p674_p1 = pnand %p673_p0, %p667_p11 }
  0x1f   :  { %677 = shalt.err (!%p674_p1)  }
  0x20   :  { %39 = dma.hbm_to_vmem [thread:$0]  %s991_s1, 64, %s37_s14, [#allocation10 + $0x1] }
  0x21   :  { %s810_s12 = smov [#allocation4]   ;;  %s811_s15 = smov [#allocation5]  }
  0x22   :  { %s48_s13 = sshll.u32 %s810_s12, 4  ;;  %s60_s16 = sshll.u32 %s811_s15, 4  ;;  %s49_s13 = int_to_ptr.vmem [resolvable:$true] %s48_s13  ;;  %s61_s16 = int_to_ptr.vmem [resolvable:$true] %s60_s16 }
  0x23   :  { %s678_s19 = scalar_lea.hbm %s992_s2, 32 }
  0x24   :  { %p679_p2 = scmp.ne.s32.totalorder %s992_s2, %s678_s19  ;;  %p682_p3 = scmp.lt.u32.totalorder %s678_s19, %s992_s2 }
  0x26   :  { %p684_p4 = pnand %p682_p3, %p679_p2 }
  0x28   :  { %687 = shalt.err (!%p684_p4)  }
  0x29   :  { %s688_s1 = scalar_lea.vmem %s49_s13, 32  ;;  %p693_p6 = scmp.lt.s32.totalorder %s49_s13, %s49_s13 }
  0x2a   :  { %p689_p5 = scmp.ne.s32.totalorder %s49_s13, %s688_s1  ;;  %p694_p7 = scmp.lt.s32.totalorder %s688_s1, %s688_s1 }
  0x2c   :  { %p695_p8 = por %p694_p7, %p693_p6 }
  0x2e   :  { %p696_p9 = pnand %p695_p8, %p689_p5 }
  0x30   :  { %699 = shalt.err (!%p696_p9)  }
  0x31   :  { %51 = dma.hbm_to_vmem [thread:$0]  %s992_s2, 32, %s49_s13, [#allocation10 + $0x2] }
  0x32   :  { %s700_s26 = scalar_lea.hbm %s993_s3, 512 }
  0x33   :  { %p701_p10 = scmp.ne.s32.totalorder %s993_s3, %s700_s26  ;;  %p704_p11 = scmp.lt.u32.totalorder %s700_s26, %s993_s3 }
  0x35   :  { %p706_p12 = pnand %p704_p11, %p701_p10 }
  0x37   :  { %709 = shalt.err (!%p706_p12)  }
  0x38   :  { %s710_s10 = scalar_lea.vmem %s61_s16, 512  ;;  %p715_p0 = scmp.lt.s32.totalorder %s61_s16, %s61_s16 }
  0x39   :  { %p711_p13 = scmp.ne.s32.totalorder %s61_s16, %s710_s10  ;;  %p716_p1 = scmp.lt.s32.totalorder %s710_s10, %s710_s10 }
  0x3b   :  { %p717_p2 = por %p716_p1, %p715_p0 }
  0x3d   :  { %p718_p3 = pnand %p717_p2, %p711_p13 }
  0x3f   :  { %721 = shalt.err (!%p718_p3)  }
  0x40   :  { %63 = dma.hbm_to_vmem [thread:$0]  %s993_s3, 512, %s61_s16, [#allocation10 + $0x3] }
  0x41   :  { %108 = vsyncadd [#allocation10 + $0x4], 96  ;;  %v127_v1 = vld [vmem:[%s995_s5] sm:$0xf] }
  0x42   :  { %128 = vst [vmem:[#allocation7] sm:$0xf] %v127_v1 }
  0x43   :  { %153 = vsyncadd [#allocation10 + $0x5], 64  ;;  %v172_v2 = vld [vmem:[%s996_s6] sm:$0x3] }
  0x44   :  { %173 = vst [vmem:[#allocation8] sm:$0x3] %v172_v2 }
  0x45   :  { %198 = vsyncadd [#allocation10 + $0x6], 32  ;;  %s812_s17 = smov [#allocation9]   ;;  %s722_s3 = scalar_lea.hbm %s997_s7, 512 }
  0x46   :  { %s207_s18 = sshll.u32 %s812_s17, 4  ;;  %p723_p4 = scmp.ne.s32.totalorder %s997_s7, %s722_s3  ;;  %s208_s18 = int_to_ptr.vmem [resolvable:$true] %s207_s18 }
  0x47   :  { %p726_p5 = scmp.lt.u32.totalorder %s722_s3, %s997_s7 }
  0x49   :  { %p728_p6 = pnand %p726_p5, %p723_p4 }
  0x4b   :  { %731 = shalt.err (!%p728_p6)  }
  0x4c   :  { %s732_s6 = scalar_lea.vmem %s208_s18, 512  ;;  %p737_p8 = scmp.lt.s32.totalorder %s208_s18, %s208_s18 }
  0x4d   :  { %p733_p7 = scmp.ne.s32.totalorder %s208_s18, %s732_s6  ;;  %p738_p9 = scmp.lt.s32.totalorder %s732_s6, %s732_s6 }
  0x4f   :  { %p739_p10 = por %p738_p9, %p737_p8 }
  0x51   :  { %p740_p11 = pnand %p739_p10, %p733_p7 }
  0x53   :  { %743 = shalt.err (!%p740_p11)  }
  0x54   :  { %210 = dma.hbm_to_vmem [thread:$0]  %s997_s7, 512, %s208_s18, [#allocation10 + $0x7] }
  0x55   :  { %788 = dma.done.wait [#allocation10], 96 }
  0x56   :  { %789 = vsyncadd [#allocation10], 4294967200  ;;  %v223_v3 = vlaneseq  ;;  %v813_v4 = vmov 1983009808   ;;  %v215_v8 = vld [vmem:[#allocation2] sm:$0x3f] }
  0x57   :  { %v221_v5 = vunpack.c.l.s4 %v813_v4  ;;  %v216_v9 = vadd.f32 1.0, %v215_v8  ;;  %vm238_vm0 = vcmask 1041408   ;;  %vm253_vm1 = vcmask 738304  }
  0x58   :  { %v224_v7 = vshrl.u32 %v223_v3, 7  ;;  %vm265_vm2 = vcmask 744448  }
  0x59   :  { %v222_v6 = vunpack.c.0.s8 %v221_v5  ;;  %v217_v11 = vmax.f32 %v216_v9, 0.0 }
  0x5b   :  { %v935_v10 = vsub.s32 %v222_v6, %v224_v7  ;;  %v219_v12 = vcombine.high %v217_v11, %v217_v11 }
  0x5d   :  { %v226_v13 = vrot.slane %v217_v11, %v935_v10  ;;  %v233_v14 = vrot.slane %v219_v12, %v935_v10 }
  0x5f   :  { %v234_v15 = vcombine.high %v226_v13, %v226_v13  ;;  %v239_v16 = vsel %vm238_vm0, %v226_v13, 0.0  ;;  %v254_v19 = vsel %vm253_vm1, %v233_v14, 0.0 }
  0x60   :  { %v240_v17 = vrot.slane %v239_v16, 4  ;;  %v255_v22 = vrot.slane %v254_v19, 4 }
  0x61   :  { %v246_v18 = vsel %vm238_vm0, %v234_v15, 0.0 }
  0x62   :  { %v241_v20 = vadd.f32 %v240_v17, %v239_v16  ;;  %v247_v21 = vrot.slane %v246_v18, 4  ;;  %v256_v25 = vadd.f32 %v255_v22, %v254_v19 }
  0x64   :  { %v242_v23 = vrot.slane %v241_v20, 2  ;;  %v248_v24 = vadd.f32 %v247_v21, %v246_v18  ;;  %v257_v28 = vrot.slane %v256_v25, 2 }
  0x66   :  { %v243_v26 = vadd.f32 %v242_v23, %v241_v20  ;;  %v249_v27 = vrot.slane %v248_v24, 2  ;;  %v258_v31 = vadd.f32 %v257_v28, %v256_v25 }
  0x68   :  { %v244_v29 = vrot.slane %v243_v26, 1  ;;  %v250_v30 = vadd.f32 %v249_v27, %v248_v24  ;;  %v259_v34 = vrot.slane %v258_v31, 1 }
  0x6a   :  { %v245_v32 = vadd.f32 %v244_v29, %v243_v26  ;;  %v251_v33 = vrot.slane %v250_v30, 1  ;;  %v260_v36 = vadd.f32 %v259_v34, %v258_v31 }
  0x6c   :  { %v252_v35 = vadd.f32 %v251_v33, %v250_v30  ;;  %v266_v38 = vsel %vm265_vm2, %v260_v36, 0.0 }
  0x6e   :  { %v264_v37 = vadd.f32 %v252_v35, %v245_v32 }
  0x70   :  { %v267_v39 = vadd.f32 %v266_v38, %v264_v37 }
  0x72   :  { %268 = vadd.xlane.f32.xlu0 %v267_v39 }
  0xff   :  { %v269_v40 = vpop.xlane.xlu0 %268 }
 0x100   :  { %v270_v41 = vmul.f32 0.0014409221, %v269_v40 }
 0x101   :  { %790 = dma.done.wait [#allocation10 + $0x1], 64 }
 0x102   :  { %791 = vsyncadd [#allocation10 + $0x1], 4294967232  ;;  %v275_v42 = vld [vmem:[#allocation3] sm:$0xf]  ;;  %vm296_vm3 = vcmask 361472   ;;  %vm306_vm4 = vcmask 367616  }
 0x103   :  { %v276_v43 = vadd.f32 1.0, %v275_v42 }
 0x105   :  { %v277_v44 = vmax.f32 %v276_v43, 0.0 }
 0x107   :  { %v285_v45 = vrot.slane %v277_v44, %v935_v10 }
 0x109   :  { %v286_v46 = vcombine.high %v285_v45, %v285_v45  ;;  %v289_v47 = vsel %vm238_vm0, %v285_v45, 0.0 }
 0x10a   :  { %v290_v48 = vrot.slane %v289_v47, 4 }
 0x10b   :  { %v297_v49 = vsel %vm296_vm3, %v286_v46, 0.0 }
 0x10c   :  { %v291_v50 = vadd.f32 %v290_v48, %v289_v47  ;;  %v298_v51 = vrot.slane %v297_v49, 4 }
 0x10e   :  { %v292_v52 = vrot.slane %v291_v50, 2  ;;  %v299_v53 = vadd.f32 %v298_v51, %v297_v49 }
 0x110   :  { %v293_v54 = vadd.f32 %v292_v52, %v291_v50  ;;  %v300_v55 = vrot.slane %v299_v53, 2 }
 0x112   :  { %v294_v56 = vrot.slane %v293_v54, 1  ;;  %v301_v57 = vadd.f32 %v300_v55, %v299_v53 }
 0x114   :  { %v302_v58 = vrot.slane %v301_v57, 1  ;;  %v295_v59 = vadd.f32 %v294_v56, %v293_v54 }
 0x116   :  { %v303_v60 = vadd.f32 %v302_v58, %v301_v57 }
 0x118   :  { %v307_v61 = vsel %vm306_vm4, %v303_v60, 0.0 }
 0x119   :  { %v308_v62 = vadd.f32 %v307_v61, %v295_v59 }
 0x11b   :  { %309 = vadd.xlane.f32.xlu0 %v308_v62 }
 0x1a8   :  { %v310_v63 = vpop.xlane.xlu0 %309 }
 0x1a9   :  { %v311_v0 = vmul.f32 0.0028901733, %v310_v63 }
 0x1ab   :  { %v312_v1 = vadd.f32 %v311_v0, %v270_v41 }
 0x1ac   :  { %792 = dma.done.wait [#allocation10 + $0x2], 32 }
 0x1ad   :  { %793 = vsyncadd [#allocation10 + $0x2], 4294967264  ;;  %v315_v2 = vld [vmem:[#allocation4] sm:$0x3]  ;;  %vm318_vm5 = vcmask 705536   ;;  %vm327_vm6 = vcmask 711680  }
 0x1ae   :  { %v316_v3 = vadd.f32 1.0, %v315_v2 }
 0x1b0   :  { %v317_v4 = vmax.f32 %v316_v3, 0.0 }
 0x1b2   :  { %v319_v5 = vsel %vm318_vm5, %v317_v4, 0.0 }
 0x1b3   :  { %v320_v6 = vrot.slane %v319_v5, 4 }
 0x1b5   :  { %v321_v7 = vadd.f32 %v320_v6, %v319_v5 }
 0x1b7   :  { %v322_v8 = vrot.slane %v321_v7, 2 }
 0x1b9   :  { %v323_v9 = vadd.f32 %v322_v8, %v321_v7 }
 0x1bb   :  { %v324_v11 = vrot.slane %v323_v9, 1 }
 0x1bd   :  { %v325_v12 = vadd.f32 %v324_v11, %v323_v9 }
 0x1bf   :  { %v328_v13 = vsel %vm327_vm6, %v325_v12, 0.0 }
 0x1c0   :  { %329 = vadd.xlane.f32.xlu0 %v328_v13 }
 0x24d   :  { %v330_v14 = vpop.xlane.xlu0 %329 }
 0x24e   :  { %v331_v15 = vmul.f32 0.0057471264, %v330_v14 }
 0x250   :  { %v332_v16 = vadd.f32 %v331_v15, %v312_v1 }
 0x251   :  { %794 = dma.done.wait [#allocation10 + $0x3], 512 }
 0x252   :  { %795 = vsyncadd [#allocation10 + $0x3], 4294966784  ;;  %v336_v17 = vld [vmem:[#allocation5] sm:$0xff]  ;;  %v337_v18 = vld [vmem:[#allocation5 + $0x8] sm:$0xff] }
 0x253   :  { %v338_v19 = vld [vmem:[#allocation5 + $0x10] sm:$0xff]  ;;  %v339_v20 = vld [vmem:[#allocation5 + $0x18] sm:$0xff]  ;;  %v340_v21 = vadd.f32 1.0, %v336_v17  ;;  %v341_v22 = vadd.f32 1.0, %v337_v18 }
 0x254   :  { %v342_v23 = vadd.f32 1.0, %v338_v19  ;;  %v343_v24 = vadd.f32 1.0, %v339_v20 }
 0x255   :  { %v344_v25 = vmax.f32 %v340_v21, 0.0  ;;  %v345_v26 = vmax.f32 %v341_v22, 0.0 }
 0x256   :  { %v346_v27 = vmax.f32 %v342_v23, 0.0  ;;  %v347_v28 = vmax.f32 %v343_v24, 0.0 }
 0x257   :  { %v348_v29 = vadd.f32 %v345_v26, %v344_v25 }
 0x259   :  { %v349_v30 = vadd.f32 %v348_v29, %v346_v27 }
 0x25b   :  { %v350_v31 = vadd.f32 %v349_v30, %v347_v28 }
 0x25d   :  { %v351_v32 = vrot.slane %v350_v31, 4 }
 0x25f   :  { %v352_v33 = vadd.f32 %v351_v32, %v350_v31 }
 0x261   :  { %v353_v34 = vrot.slane %v352_v33, 2 }
 0x263   :  { %v354_v35 = vadd.f32 %v353_v34, %v352_v33 }
 0x265   :  { %v355_v36 = vrot.slane %v354_v35, 1 }
 0x267   :  { %v356_v37 = vadd.f32 %v355_v36, %v354_v35 }
 0x269   :  { %358 = vadd.xlane.f32.xlu0 %v356_v37 }
 0x2f6   :  { %v359_v38 = vpop.xlane.xlu0 %358 }
 0x2f7   :  { %v360_v39 = vmul.f32 0.00024414063, %v359_v38 }
 0x2f9   :  { %v949_v40 = vadd.f32 %v360_v39, %v332_v16 }
 0x2fa   :  { %796 = dma.done.wait [#allocation10 + $0x4], 96 }
 0x2fb   :  { %797 = vsyncadd [#allocation10 + $0x4], 4294967200  ;;  %v364_v41 = vld [vmem:[#allocation6] sm:$0x3f] }
 0x2fc   :  { %v365_v42 = vsub.f32 1.0, %v364_v41 }
 0x2fe   :  { %v366_v43 = vmax.f32 %v365_v42, 0.0 }
 0x300   :  { %v368_v44 = vcombine.high %v366_v43, %v366_v43  ;;  %v375_v45 = vrot.slane %v366_v43, %v935_v10 }
 0x302   :  { %v382_v46 = vrot.slane %v368_v44, %v935_v10  ;;  %v383_v47 = vcombine.high %v375_v45, %v375_v45  ;;  %v387_v48 = vsel %vm238_vm0, %v375_v45, 0.0 }
 0x303   :  { %v388_v49 = vrot.slane %v387_v48, 4 }
 0x304   :  { %v394_v50 = vsel %vm238_vm0, %v383_v47, 0.0  ;;  %v401_v51 = vsel %vm253_vm1, %v382_v46, 0.0 }
 0x305   :  { %v389_v52 = vadd.f32 %v388_v49, %v387_v48  ;;  %v395_v53 = vrot.slane %v394_v50, 4  ;;  %v402_v54 = vrot.slane %v401_v51, 4 }
 0x307   :  { %v396_v55 = vadd.f32 %v395_v53, %v394_v50  ;;  %v390_v56 = vrot.slane %v389_v52, 2  ;;  %v403_v57 = vadd.f32 %v402_v54, %v401_v51 }
 0x309   :  { %v391_v58 = vadd.f32 %v390_v56, %v389_v52  ;;  %v397_v59 = vrot.slane %v396_v55, 2  ;;  %v404_v60 = vrot.slane %v403_v57, 2 }
 0x30b   :  { %v392_v61 = vrot.slane %v391_v58, 1  ;;  %v398_v62 = vadd.f32 %v397_v59, %v396_v55  ;;  %v405_v63 = vadd.f32 %v404_v60, %v403_v57 }
 0x30d   :  { %v393_v0 = vadd.f32 %v392_v61, %v391_v58  ;;  %v399_v1 = vrot.slane %v398_v62, 1  ;;  %v406_v2 = vrot.slane %v405_v63, 1 }
 0x30f   :  { %v400_v3 = vadd.f32 %v399_v1, %v398_v62  ;;  %v407_v4 = vadd.f32 %v406_v2, %v405_v63 }
 0x311   :  { %v411_v5 = vadd.f32 %v400_v3, %v393_v0  ;;  %v412_v6 = vsel %vm265_vm2, %v407_v4, 0.0 }
 0x313   :  { %v413_v7 = vadd.f32 %v412_v6, %v411_v5 }
 0x315   :  { %414 = vadd.xlane.f32.xlu0 %v413_v7 }
 0x3a2   :  { %v415_v8 = vpop.xlane.xlu0 %414 }
 0x3a3   :  { %v416_v9 = vmul.f32 0.0014409221, %v415_v8 }
 0x3a4   :  { %798 = dma.done.wait [#allocation10 + $0x5], 64 }
 0x3a5   :  { %799 = vsyncadd [#allocation10 + $0x5], 4294967232  ;;  %v420_v11 = vld [vmem:[#allocation7] sm:$0xf] }
 0x3a6   :  { %v421_v12 = vsub.f32 1.0, %v420_v11 }
 0x3a8   :  { %v422_v13 = vmax.f32 %v421_v12, 0.0 }
 0x3aa   :  { %v430_v14 = vrot.slane %v422_v13, %v935_v10 }
 0x3ac   :  { %v431_v15 = vcombine.high %v430_v14, %v430_v14  ;;  %v434_v16 = vsel %vm238_vm0, %v430_v14, 0.0 }
 0x3ad   :  { %v435_v17 = vrot.slane %v434_v16, 4 }
 0x3ae   :  { %v441_v18 = vsel %vm296_vm3, %v431_v15, 0.0 }
 0x3af   :  { %v436_v19 = vadd.f32 %v435_v17, %v434_v16  ;;  %v442_v20 = vrot.slane %v441_v18, 4 }
 0x3b1   :  { %v437_v21 = vrot.slane %v436_v19, 2  ;;  %v443_v22 = vadd.f32 %v442_v20, %v441_v18 }
 0x3b3   :  { %v438_v23 = vadd.f32 %v437_v21, %v436_v19  ;;  %v444_v24 = vrot.slane %v443_v22, 2 }
 0x3b5   :  { %v439_v25 = vrot.slane %v438_v23, 1  ;;  %v445_v26 = vadd.f32 %v444_v24, %v443_v22 }
 0x3b7   :  { %v446_v27 = vrot.slane %v445_v26, 1  ;;  %v440_v28 = vadd.f32 %v439_v25, %v438_v23 }
 0x3b9   :  { %v447_v29 = vadd.f32 %v446_v27, %v445_v26 }
 0x3bb   :  { %v450_v30 = vsel %vm306_vm4, %v447_v29, 0.0 }
 0x3bc   :  { %v451_v10 = vadd.f32 %v450_v30, %v440_v28 }
 0x3be   :  { %452 = vadd.xlane.f32.xlu0 %v451_v10 }
 0x44b   :  { %v453_v31 = vpop.xlane.xlu0 %452 }
 0x44c   :  { %v454_v32 = vmul.f32 0.0028901733, %v453_v31 }
 0x44e   :  { %v455_v33 = vadd.f32 %v454_v32, %v416_v9 }
 0x44f   :  { %800 = dma.done.wait [#allocation10 + $0x6], 32 }
 0x450   :  { %801 = vsyncadd [#allocation10 + $0x6], 4294967264  ;;  %v458_v34 = vld [vmem:[#allocation8] sm:$0x3] }
 0x451   :  { %v459_v35 = vsub.f32 1.0, %v458_v34 }
 0x453   :  { %v460_v36 = vmax.f32 %v459_v35, 0.0 }
 0x455   :  { %v461_v37 = vsel %vm318_vm5, %v460_v36, 0.0 }
 0x456   :  { %v462_v38 = vrot.slane %v461_v37, 4 }
 0x458   :  { %v463_v39 = vadd.f32 %v462_v38, %v461_v37 }
 0x45a   :  { %v464_v41 = vrot.slane %v463_v39, 2 }
 0x45c   :  { %v465_v42 = vadd.f32 %v464_v41, %v463_v39 }
 0x45e   :  { %v466_v43 = vrot.slane %v465_v42, 1 }
 0x460   :  { %v467_v44 = vadd.f32 %v466_v43, %v465_v42 }
 0x462   :  { %v469_v45 = vsel %vm327_vm6, %v467_v44, 0.0 }
 0x463   :  { %470 = vadd.xlane.f32.xlu0 %v469_v45 }
 0x4f0   :  { %v471_v46 = vpop.xlane.xlu0 %470 }
 0x4f1   :  { %v472_v47 = vmul.f32 0.0057471264, %v471_v46 }
 0x4f3   :  { %v473_v48 = vadd.f32 %v472_v47, %v455_v33 }
 0x4f4   :  { %802 = dma.done.wait [#allocation10 + $0x7], 512 }
 0x4f5   :  { %803 = vsyncadd [#allocation10 + $0x7], 4294966784  ;;  %v476_v49 = vld [vmem:[#allocation9] sm:$0xff]  ;;  %v477_v50 = vld [vmem:[#allocation9 + $0x8] sm:$0xff]  ;;  %vm502_vm7 = vcmask 0   ;;  %s814_s7 = smov [#allocation11]  }
 0x4f6   :  { %v478_v51 = vld [vmem:[#allocation9 + $0x10] sm:$0xff]  ;;  %v479_v52 = vld [vmem:[#allocation9 + $0x18] sm:$0xff]  ;;  %v480_v53 = vsub.f32 1.0, %v476_v49  ;;  %v481_v54 = vsub.f32 1.0, %v477_v50  ;;  %503 = vst.msk [vmem:[#allocation11] sm:$0x1] %vm502_vm7, %v949_v40 }
 0x4f7   :  { %v482_v55 = vsub.f32 1.0, %v478_v51  ;;  %v483_v56 = vsub.f32 1.0, %v479_v52  ;;  %s511_s14 = sshll.u32 %s814_s7, 4  ;;  %s512_s14 = int_to_ptr.vmem [resolvable:$true] %s511_s14 }
 0x4f8   :  { %v484_v57 = vmax.f32 %v480_v53, 0.0  ;;  %v485_v58 = vmax.f32 %v481_v54, 0.0  ;;  %s744_s23 = scalar_lea.vmem %s512_s14, 16  ;;  %s748_s24 = scalar_lea.vmem %s512_s14, 32 }
 0x4f9   :  { %v486_v59 = vmax.f32 %v482_v55, 0.0  ;;  %v487_v60 = vmax.f32 %v483_v56, 0.0  ;;  %p745_p12 = scmp.ne.s32.totalorder %s512_s14, %s744_s23  ;;  %p749_p13 = scmp.lt.s32.totalorder %s512_s14, %s512_s14 }
 0x4fa   :  { %v488_v61 = vadd.f32 %v485_v58, %v484_v57  ;;  %p750_p0 = scmp.lt.s32.totalorder %s748_s24, %s744_s23 }
 0x4fc   :  { %v489_v62 = vadd.f32 %v488_v61, %v486_v59  ;;  %p751_p1 = por %p750_p0, %p749_p13 }
 0x4fe   :  { %v490_v63 = vadd.f32 %v489_v62, %v487_v60  ;;  %p752_p2 = pnand %p751_p1, %p745_p12 }
 0x500   :  { %v491_v0 = vrot.slane %v490_v63, 4 }
 0x502   :  { %v492_v1 = vadd.f32 %v491_v0, %v490_v63 }
 0x504   :  { %v493_v2 = vrot.slane %v492_v1, 2 }
 0x506   :  { %v494_v3 = vadd.f32 %v493_v2, %v492_v1 }
 0x508   :  { %v495_v4 = vrot.slane %v494_v3, 1 }
 0x50a   :  { %v496_v5 = vadd.f32 %v495_v4, %v494_v3 }
 0x50c   :  { %498 = vadd.xlane.f32.xlu0 %v496_v5 }
 0x50d   :  { %755 = shalt.err (!%p752_p2)
}
 0x50e   :  { %s756_s27 = scalar_lea.hbm %s998_s8, 16 }
 0x50f   :  { %p757_p3 = scmp.ne.s32.totalorder %s998_s8, %s756_s27  ;;  %p760_p4 = scmp.lt.u32.totalorder %s756_s27, %s998_s8 }
 0x511   :  { %p762_p5 = pnand %p760_p4, %p757_p3 }
 0x513   :  { %765 = shalt.err (!%p762_p5)
}
 0x514   :  { %514 = dma.vmem_to_hbm [thread:$0]  %s512_s14, 16, %s998_s8, [#allocation12]  }
 0x515   :  { %s815_s11 = smov [#allocation13]  }
 0x516   :  { %s521_s12 = sshll.u32 %s815_s11, 4  ;;  %s522_s12 = int_to_ptr.vmem [resolvable:$true] %s521_s12 }
 0x517   :  { %s766_s13 = scalar_lea.vmem %s522_s12, 16  ;;  %s770_s15 = scalar_lea.vmem %s522_s12, 32 }
 0x518   :  { %p767_p6 = scmp.ne.s32.totalorder %s522_s12, %s766_s13  ;;  %p771_p7 = scmp.lt.s32.totalorder %s522_s12, %s522_s12 }
 0x519   :  { %p772_p8 = scmp.lt.s32.totalorder %s770_s15, %s766_s13 }
 0x51b   :  { %p773_p9 = por %p772_p8, %p771_p7 }
 0x51d   :  { %p774_p10 = pnand %p773_p9, %p767_p6 }
 0x599   :  { %v499_v40 = vpop.xlane.xlu0 %498 }
 0x59a   :  { %v500_v6 = vmul.f32 0.00024414063, %v499_v40 }
 0x59c   :  { %v501_v7 = vadd.f32 %v500_v6, %v473_v48 }
 0x59e   :  { %504 = vst.msk [vmem:[#allocation13] sm:$0x1] %vm502_vm7, %v501_v7 }
 0x59f   :  { %777 = shalt.err (!%p774_p10)
}
 0x5a0   :  { %s778_s8 = scalar_lea.hbm %s999_s9, 16 }
 0x5a1   :  { %p779_p11 = scmp.ne.s32.totalorder %s999_s9, %s778_s8  ;;  %p782_p12 = scmp.lt.u32.totalorder %s778_s8, %s999_s9 }
 0x5a3   :  { %p784_p13 = pnand %p782_p12, %p779_p11 }
 0x5a5   :  { %787 = shalt.err (!%p784_p13)
}
 0x5a6   :  { %524 = dma.vmem_to_hbm [thread:$0]  %s522_s12, 16, %s999_s9, [#allocation14]  }
 0x5a7   :  { %804 = dma.done.wait [#allocation12], 16  }
 0x5a8   :  { %805 = vsyncadd [#allocation12], 4294967280 }
 0x5a9   :  { %806 = dma.done.wait [#allocation14], 16  }
 0x5aa   :  { %807 = vsyncadd [#allocation14], 4294967280 }
 0x5ab   :  { %531 = vsyncpa [#allocation12], 1 }
 0x5ac   :  { %532 = vsyncpa [#allocation14], 1 }
 0x5ad   :  { %533 = vsyncmov [#allocation10] }
 0x5b0   :  { %s534_s4 = vpop.sfrf %533 }
 0x5b1   :  { %p618_p0 = scmp.ne.s32.totalorder %s534_s4, 0 }
 0x5b3   :  { %538 = shalt.err (%p618_p0)  }
 0x5b4   :  { %540 = vsyncmov [#allocation10 + $0x1] }
 0x5b7   :  { %s541_s6 = vpop.sfrf %540 }
 0x5b8   :  { %p619_p1 = scmp.ne.s32.totalorder %s541_s6, 0 }
 0x5ba   :  { %545 = shalt.err (%p619_p1)  }
 0x5bb   :  { %547 = vsyncmov [#allocation10 + $0x2] }
 0x5be   :  { %s548_s22 = vpop.sfrf %547 }
 0x5bf   :  { %p620_p2 = scmp.ne.s32.totalorder %s548_s22, 0 }
 0x5c1   :  { %552 = shalt.err (%p620_p2)  }
 0x5c2   :  { %554 = vsyncmov [#allocation10 + $0x3] }
 0x5c5   :  { %s555_s9 = vpop.sfrf %554 }
 0x5c6   :  { %p621_p3 = scmp.ne.s32.totalorder %s555_s9, 0 }
 0x5c8   :  { %559 = shalt.err (%p621_p3)  }
 0x5c9   :  { %561 = vsyncmov [#allocation10 + $0x4] }
 0x5cc   :  { %s562_s1 = vpop.sfrf %561 }
 0x5cd   :  { %p622_p4 = scmp.ne.s32.totalorder %s562_s1, 0 }
 0x5cf   :  { %566 = shalt.err (%p622_p4)  }
 0x5d0   :  { %568 = vsyncmov [#allocation10 + $0x5] }
 0x5d3   :  { %s569_s7 = vpop.sfrf %568 }
 0x5d4   :  { %p623_p5 = scmp.ne.s32.totalorder %s569_s7, 0 }
 0x5d6   :  { %573 = shalt.err (%p623_p5)  }
 0x5d7   :  { %575 = vsyncmov [#allocation10 + $0x6] }
 0x5da   :  { %s576_s14 = vpop.sfrf %575 }
 0x5db   :  { %p624_p6 = scmp.ne.s32.totalorder %s576_s14, 0 }
 0x5dd   :  { %580 = shalt.err (%p624_p6)  }
 0x5de   :  { %582 = vsyncmov [#allocation10 + $0x7] }
 0x5e1   :  { %s583_s23 = vpop.sfrf %582 }
 0x5e2   :  { %p625_p7 = scmp.ne.s32.totalorder %s583_s23, 0 }
 0x5e4   :  { %587 = shalt.err (%p625_p7)  }

</bundles_post_ra>
